<compile_context>
chip_gen: v6e
topology: v6e:2x2x1
jax: 0.10.0
libtpu: 0.0.40
codegen_flags: <defaults>
</compile_context>

<pallas_src>
import math

import jax
import jax.numpy as jnp
from jax.experimental import pallas as pl
from jax.experimental.pallas import tpu as pltpu


def _cdiv(a, b):
    return -(-a // b)


def _vmem_limit_bytes():
    """Generation-aware scoped-VMEM budget (leave headroom below physical)."""
    try:
        cap = int(pltpu.get_tpu_info().vmem_capacity_bytes)
    except Exception:
        cap = 64 * 1024 * 1024   # conservative: v7x physical VMEM per core
    # ~25% headroom for Mosaic internal scratch / metadata; cap at 96 MiB.
    return min(cap * 3 // 4, 96 * 1024 * 1024)


def _make_concat_kernel(channel_sizes):
    """Kernel copying each input into its static channel slab of the output."""
    offsets = [0]
    for c in channel_sizes[:-1]:
        offsets.append(offsets[-1] + c)

    def kernel(*refs):
        *x_refs, o_ref = refs
        for x_ref, c, o in zip(x_refs, channel_sizes, offsets):
            # Static offsets/sizes -> plain VMEM stores; cast on store so
            # dtype promotion never costs an extra HBM pass in the wrapper.
            o_ref[:, o:o + c, :] = x_ref[...].astype(o_ref.dtype)

    return kernel


def _choose_tiles(lead, trail, c_total, itemsize, block_budget):
    """Pick (tile_lead, tile_t): lane-dense and as large as the budget allows."""
    row_bytes = c_total * itemsize            # bytes of one (C_total, 1) column
    if trail * row_bytes <= block_budget:
        # Whole trailing extent fits: fold lead rows into the block too.
        tile_t = trail
        tile_lead = min(lead, max(1, block_budget // max(1, trail * row_bytes)))
        # Prefer an exact divisor of lead so every block is full (a ragged
        # final block would still be correct, just masked).
        while tile_lead > 1 and lead % tile_lead:
            tile_lead -= 1
    else:
        tile_lead = 1
        max_t = max(128, (block_budget // max(1, row_bytes)) // 128 * 128)
        tile_t = min(trail, max_t)
        # Prefer a multiple of 128 that divides trail exactly (keeps every
        # trail tile full-width and every store unmasked).
        t = (tile_t // 128) * 128
        while t >= 128:
            if trail % t == 0:
                tile_t = t
                break
            t -= 128
    return tile_lead, tile_t


def concat_forward(xs, dimension=1, *, small_bytes_fallback=1 << 20):
    """Concatenate a list of arrays along `dimension` (torch.cat semantics)."""
    xs = [jnp.asarray(x) for x in xs]
    assert len(xs) >= 1
    rank = xs[0].ndim
    d = dimension % rank
    base = xs[0].shape
    for x in xs[1:]:
        assert x.ndim == rank
        assert x.shape[:d] == base[:d] and x.shape[d + 1:] == base[d + 1:]

    dtype = jnp.result_type(*[x.dtype for x in xs])
    if len(xs) == 1:
        return xs[0].astype(dtype)

    lead = math.prod(base[:d]) if d > 0 else 1
    trail = math.prod(base[d + 1:]) if d + 1 < rank else 1
    chans = [int(x.shape[d]) for x in xs]
    c_total = sum(chans)
    out_shape = base[:d] + (c_total,) + base[d + 1:]

    itemsize = jnp.dtype(dtype).itemsize
    out_bytes = lead * c_total * trail * itemsize
    in_bytes = sum(int(x.size) * jnp.dtype(x.dtype).itemsize for x in xs)

    # Fallbacks: degenerate/tiny shapes and last-dim concat (trail == 1 would
    # force lane-width-1 masked stores) -> XLA's native concat is optimal.
    degenerate = (lead == 0 or trail <= 1 or c_total == 0
                  or any(c == 0 for c in chans))
    if degenerate or out_bytes < small_bytes_fallback:
        return jnp.concatenate([x.astype(dtype) for x in xs], axis=d)

    vmem_limit = _vmem_limit_bytes()
    # inputs + output, each double-buffered ~= 4x the output block.
    block_budget = min(vmem_limit // 4, 16 * 1024 * 1024)
    tile_lead, tile_t = _choose_tiles(lead, trail, c_total, itemsize,
                                      block_budget)

    # If even the smallest legal block cannot be double-buffered, bail out.
    if tile_lead * c_total * tile_t * itemsize * 4 > vmem_limit:
        return jnp.concatenate([x.astype(dtype) for x in xs], axis=d)

    # Megacore (v7x has 2 TCs): make sure a sizeable copy has >= 2 grid steps.
    if (_cdiv(lead, tile_lead) * _cdiv(trail, tile_t) == 1
            and out_bytes > 4 * 1024 * 1024):
        if lead > 1:
            tile_lead = _cdiv(lead, 2)
        elif trail >= 256:
            tile_t = max(128, ((trail // 2) // 128) * 128)

    grid = (_cdiv(lead, tile_lead), _cdiv(trail, tile_t))

    # Free reshapes (no transpose): (lead, C_i, trail) views.
    xs3 = [x.reshape(lead, c, trail) for x, c in zip(xs, chans)]

    in_specs = [
        pl.BlockSpec((tile_lead, c, tile_t), lambda b, t: (b, 0, t))
        for c in chans
    ]
    out_spec = pl.BlockSpec((tile_lead, c_total, tile_t),
                            lambda b, t: (b, 0, t))

    out3 = pl.pallas_call(
        _make_concat_kernel(chans),
        out_shape=jax.ShapeDtypeStruct((lead, c_total, trail), dtype),
        grid_spec=pltpu.PrefetchScalarGridSpec(
            num_scalar_prefetch=0,
            grid=grid,
            in_specs=in_specs,
            out_specs=out_spec,
        ),
        compiler_params=pltpu.CompilerParams(
            dimension_semantics=("parallel", "parallel"),
            vmem_limit_bytes=vmem_limit,
        ),
        cost_estimate=pl.CostEstimate(
            flops=0, transcendentals=0, bytes_accessed=in_bytes + out_bytes),
    )(*xs3)

    return out3.reshape(out_shape)


if __name__ == "__main__":
    key = jax.random.PRNGKey(0)
    k0, k1, k2, k3, k4 = jax.random.split(key, 5)

    # 1) YOLO-style NCHW channel concat (dim=1).  Force the Pallas path even
    #    at this small demo size (default would take the tiny-tensor fallback).
    x0 = jax.random.normal(k0, (2, 4, 16, 16), dtype=jnp.float32)
    x1 = jax.random.normal(k1, (2, 8, 16, 16), dtype=jnp.float32)
    x2 = jax.random.normal(k2, (2, 4, 16, 16), dtype=jnp.float32)
    out = jax.block_until_ready(
        concat_forward([x0, x1, x2], dimension=1, small_bytes_fallback=0))
    ref = jnp.concatenate([x0, x1, x2], axis=1)
    assert out.shape == (2, 16, 16, 16), out.shape
    assert jnp.array_equal(out, ref)

    # 2) Sublane-misaligned channel counts, non-128 trailing extent, and a
    #    mixed-dtype input (the cast happens inside the kernel).
    y0 = jax.random.normal(k3, (2, 13, 20, 20), dtype=jnp.float32)
    y1 = jax.random.normal(k4, (2, 7, 20, 20), dtype=jnp.bfloat16)
    out2 = jax.block_until_ready(
        concat_forward([y0, y1], dimension=1, small_bytes_fallback=0))
    ref2 = jnp.concatenate([y0, y1], axis=1)
    assert out2.shape == ref2.shape and out2.dtype == ref2.dtype
    assert jnp.array_equal(out2, ref2)

    # 3) Last-dim concat (trail == 1) routes to the jnp.concatenate fallback.
    z = [x0, x1[:, :4], x2]
    out3 = jax.block_until_ready(concat_forward(z, dimension=-1))
    assert jnp.array_equal(out3, jnp.concatenate(z, axis=-1))

    print("KERNEL_OK")
</pallas_src>

<mosaic_0001>
module attributes {stable_mosaic.version = 11 : i64} {
  func.func @kernel(%arg0: i32, %arg1: i32, %arg2: memref<2x4x256xf32, #tpu.memory_space<vmem>>, %arg3: memref<2x8x256xf32, #tpu.memory_space<vmem>>, %arg4: memref<2x4x256xf32, #tpu.memory_space<vmem>>, %arg5: memref<2x16x256xf32, #tpu.memory_space<vmem>>) attributes {dimension_semantics = [#tpu.dimension_semantics<parallel>, #tpu.dimension_semantics<parallel>], iteration_bounds = array<i64: 1, 1>, scalar_prefetch = 0 : i64, scratch_operands = 0 : i64, tpu.core_type = #tpu.core_type<tc>, window_params = [{transform_indices = @transform_0, window_bounds = array<i64: 2, 4, 256>}, {transform_indices = @transform_1, window_bounds = array<i64: 2, 8, 256>}, {transform_indices = @transform_2, window_bounds = array<i64: 2, 4, 256>}, {transform_indices = @transform_3, window_bounds = array<i64: 2, 16, 256>}]} {
    %c0 = arith.constant 0 : index
    %c0_0 = arith.constant 0 : index
    %c0_1 = arith.constant 0 : index
    %0 = vector.load %arg2[%c0, %c0_0, %c0_1] : memref<2x4x256xf32, #tpu.memory_space<vmem>>, vector<2x4x256xf32>
    %c0_2 = arith.constant 0 : index
    %c0_3 = arith.constant 0 : index
    %c0_4 = arith.constant 0 : index
    %1 = vector.load %arg5[%c0_2, %c0_3, %c0_4] : memref<2x16x256xf32, #tpu.memory_space<vmem>>, vector<2x4x256xf32>
    tpu.vector_store %arg5[%c0_2, %c0_3, %c0_4], %0 {strides = array<i32>} : memref<2x16x256xf32, #tpu.memory_space<vmem>>, vector<2x4x256xf32>,
    %c0_5 = arith.constant 0 : index
    %c0_6 = arith.constant 0 : index
    %c0_7 = arith.constant 0 : index
    %2 = vector.load %arg3[%c0_5, %c0_6, %c0_7] : memref<2x8x256xf32, #tpu.memory_space<vmem>>, vector<2x8x256xf32>
    %c0_8 = arith.constant 0 : index
    %c4 = arith.constant 4 : index
    %c0_9 = arith.constant 0 : index
    %3 = vector.load %arg5[%c0_8, %c4, %c0_9] : memref<2x16x256xf32, #tpu.memory_space<vmem>>, vector<2x8x256xf32>
    tpu.vector_store %arg5[%c0_8, %c4, %c0_9], %2 {strides = array<i32>} : memref<2x16x256xf32, #tpu.memory_space<vmem>>, vector<2x8x256xf32>,
    %c0_10 = arith.constant 0 : index
    %c0_11 = arith.constant 0 : index
    %c0_12 = arith.constant 0 : index
    %4 = vector.load %arg4[%c0_10, %c0_11, %c0_12] : memref<2x4x256xf32, #tpu.memory_space<vmem>>, vector<2x4x256xf32>
    %c0_13 = arith.constant 0 : index
    %c12 = arith.constant 12 : index
    %c0_14 = arith.constant 0 : index
    %5 = vector.load %arg5[%c0_13, %c12, %c0_14] : memref<2x16x256xf32, #tpu.memory_space<vmem>>, vector<2x4x256xf32>
    tpu.vector_store %arg5[%c0_13, %c12, %c0_14], %4 {strides = array<i32>} : memref<2x16x256xf32, #tpu.memory_space<vmem>>, vector<2x4x256xf32>,
    return
  }
  func.func @transform_0(%arg0: i32, %arg1: i32) -> (i32, i32, i32) {
    %c0_i32 = arith.constant 0 : i32
    %c0_i32_0 = arith.constant 0 : i32
    return %arg0, %c0_i32, %arg1 : i32, i32, i32
  }
  func.func @transform_1(%arg0: i32, %arg1: i32) -> (i32, i32, i32) {
    %c0_i32 = arith.constant 0 : i32
    %c0_i32_0 = arith.constant 0 : i32
    return %arg0, %c0_i32, %arg1 : i32, i32, i32
  }
  func.func @transform_2(%arg0: i32, %arg1: i32) -> (i32, i32, i32) {
    %c0_i32 = arith.constant 0 : i32
    %c0_i32_0 = arith.constant 0 : i32
    return %arg0, %c0_i32, %arg1 : i32, i32, i32
  }
  func.func @transform_3(%arg0: i32, %arg1: i32) -> (i32, i32, i32) {
    %c0_i32 = arith.constant 0 : i32
    %c0_i32_0 = arith.constant 0 : i32
    return %arg0, %c0_i32, %arg1 : i32, i32, i32
  }
}

</mosaic_0001>

<bundles_post_ra>
// kernel: tpu_custom_call.1
= control target key start
LH: loop header
LB: loop body
LE: loop exit
PB: predicated region body
PF: predicated region fallthrough
CT: control target
= control target key end

     0   :  { %8 = vsyncpa [#allocation3], 0  ;;  %s266_s0 = inlined_call_operand.hbm [shape: f32[2,4,256], index: 0, kind: input, shape index: {}]   ;;  %s267_s1 = inlined_call_operand.hbm [shape: f32[2,8,256], index: 1, kind: input, shape index: {}]   ;;  %s268_s2 = inlined_call_operand.hbm [shape: f32[2,4,256], index: 2, kind: input, shape index: {}]   ;;  %s269_s3 = inlined_call_operand.hbm [shape: f32[2,16,256], index: 3, kind: output, shape index: {}]  }
   0x1   :  { %9 = vsyncpa [#allocation6], 0 }
   0x2   :  { %10 = vsyncpa [#allocation4], 0  ;;  %s220_s12 = smov [#allocation5]  }
   0x3   :  { %s28_s13 = sshll.u32 %s220_s12, 4  ;;  %s29_s13 = int_to_ptr.vmem [resolvable:$true] %s28_s13 }
   0x4   :  { %s142_s14 = scalar_lea.vmem %s29_s13, 512  ;;  %p147_p1 = scmp.lt.s32.totalorder %s29_s13, %s29_s13 }
   0x5   :  { %p143_p0 = scmp.ne.s32.totalorder %s29_s13, %s142_s14  ;;  %p148_p2 = scmp.lt.s32.totalorder %s142_s14, %s142_s14 }
   0x7   :  { %p149_p3 = por %p148_p2, %p147_p1 }
   0x9   :  { %p150_p4 = pnand %p149_p3, %p143_p0 }
   0xb   :  { %153 = shalt.err (!%p150_p4)
}
   0xc   :  { %s221_s15 = smov 256   ;;  %s222_s16 = smov 16  }
   0xd   :  { %34 = dma.hbm_to_vmem [thread:$0]  %s267_s1, 512, %s29_s13, [#allocation6], %s221_s15, %s221_s15, %s222_s16  }
   0xe   :  { %s223_s19 = smov [#allocation2]  }
   0xf   :  { %s16_s20 = sshll.u32 %s223_s19, 4  ;;  %s17_s20 = int_to_ptr.vmem [resolvable:$true] %s16_s20 }
  0x10   :  { %s162_s21 = scalar_lea.vmem %s17_s20, 256  ;;  %p167_p6 = scmp.lt.s32.totalorder %s17_s20, %s17_s20 }
  0x11   :  { %p163_p5 = scmp.ne.s32.totalorder %s17_s20, %s162_s21  ;;  %p168_p7 = scmp.lt.s32.totalorder %s162_s21, %s162_s21 }
  0x13   :  { %p169_p8 = por %p168_p7, %p167_p6 }
  0x15   :  { %p170_p9 = pnand %p169_p8, %p163_p5 }
  0x17   :  { %173 = shalt.err (!%p170_p9)
}
  0x18   :  { %s224_s22 = smov 128   ;;  %s225_s23 = smov 8  }
  0x19   :  { %22 = dma.hbm_to_vmem [thread:$0]  %s266_s0, 256, %s17_s20, [#allocation3], %s224_s22, %s224_s22, %s225_s23  }
  0x1a   :  { %s226_s26 = smov [#allocation7]  }
  0x1b   :  { %s40_s27 = sshll.u32 %s226_s26, 4  ;;  %s41_s27 = int_to_ptr.vmem [resolvable:$true] %s40_s27 }
  0x1c   :  { %s182_s1 = scalar_lea.vmem %s41_s27, 256  ;;  %p187_p11 = scmp.lt.s32.totalorder %s41_s27, %s41_s27 }
  0x1d   :  { %p183_p10 = scmp.ne.s32.totalorder %s41_s27, %s182_s1  ;;  %p188_p12 = scmp.lt.s32.totalorder %s182_s1, %s182_s1 }
  0x1f   :  { %p189_p13 = por %p188_p12, %p187_p11 }
  0x21   :  { %p190_p0 = pnand %p189_p13, %p183_p10 }
  0x23   :  { %193 = shalt.err (!%p190_p0)
}
  0x24   :  { %46 = dma.hbm_to_vmem [thread:$0]  %s268_s2, 256, %s41_s27, [#allocation6], %s224_s22, %s224_s22, %s225_s23  }
  0x25   :  { %214 = dma.done.wait [#allocation3], 256  }
  0x26   :  { %215 = vsyncadd [#allocation3], 4294967040 }
  0x27   :  { %216 = dma.done.wait [#allocation6], 768  }
  0x28   :  { %217 = vsyncadd [#allocation6], 4294966528  ;;  %v56_v0 = vld [vmem:[#allocation2] sm:$0xff]  ;;  %v57_v1 = vld [vmem:[#allocation2 + $0x8] sm:$0xff]  ;;  %s227_s0 = smov [#allocation8]  }
  0x29   :  { %v68_v2 = vld [vmem:[#allocation5] sm:$0xff]  ;;  %s109_s30 = sshll.u32 %s227_s0, 4  ;;  %64 = vst [vmem:[#allocation8] sm:$0xf] %v56_v0  ;;  %v60_v3 = vcombine.high %v56_v0, %v56_v0  ;;  %66 = vst [vmem:[#allocation8 + $0x20] sm:$0xf] %v57_v1  ;;  %v61_v4 = vcombine.high %v57_v1, %v57_v1  ;;  %s110_s30 = int_to_ptr.vmem [resolvable:$true] %s109_s30 }
  0x2a   :  { %v76_v5 = vrot.slane %v68_v2, 4  ;;  %v69_v6 = vld [vmem:[#allocation5 + $0x8] sm:$0xff]  ;;  %v70_v7 = vld [vmem:[#allocation5 + $0x10] sm:$0xff]  ;;  %v71_v8 = vld [vmem:[#allocation5 + $0x18] sm:$0xff]  ;;  %s194_s2 = scalar_lea.vmem %s110_s30, 1024  ;;  %p199_p2 = scmp.lt.s32.totalorder %s110_s30, %s110_s30 }
  0x2b   :  { %v77_v9 = vrot.slane %v69_v6, 4  ;;  %v78_v10 = vrot.slane %v70_v7, 4  ;;  %v79_v11 = vrot.slane %v71_v8, 4  ;;  %v92_v12 = vld [vmem:[#allocation7] sm:$0xff]  ;;  %v93_v13 = vld [vmem:[#allocation7 + $0x8] sm:$0xff]  ;;  %p195_p1 = scmp.ne.s32.totalorder %s110_s30, %s194_s2  ;;  %p200_p3 = scmp.lt.s32.totalorder %s194_s2, %s194_s2 }
  0x2c   :  { %65 = vst [vmem:[#allocation8 + $0x8] sm:$0xf] %v60_v3  ;;  %67 = vst [vmem:[#allocation8 + $0x28] sm:$0xf] %v61_v4  ;;  %v96_v14 = vcombine.low %v92_v12, %v92_v12  ;;  %v97_v15 = vcombine.low %v93_v13, %v93_v13 }
  0x2d   :  { %84 = vst [vmem:[#allocation8 + $0x10] ss:$-12 sps:$4 sm:$0xff] %v76_v5   ;;  %101 = vst [vmem:[#allocation8 + $0x18] sm:$0xf0] %v92_v12  ;;  %p201_p4 = por %p200_p3, %p199_p2 }
  0x2e   :  { %103 = vst [vmem:[#allocation8 + $0x38] sm:$0xf0] %v93_v13  ;;  %85 = vst [vmem:[#allocation8 + $0x18] ss:$-12 sps:$4 sm:$0xff] %v77_v9  }
  0x2f   :  { %88 = vst [vmem:[#allocation8 + $0x30] ss:$-12 sps:$4 sm:$0xff] %v78_v10   ;;  %89 = vst [vmem:[#allocation8 + $0x38] ss:$-12 sps:$4 sm:$0xff] %v79_v11   ;;  %p202_p5 = pnand %p201_p4, %p195_p1 }
  0x30   :  { %100 = vst [vmem:[#allocation8 + $0x10] sm:$0xf0] %v96_v14  ;;  %102 = vst [vmem:[#allocation8 + $0x30] sm:$0xf0] %v97_v15 }
  0x31   :  { %205 = shalt.err (!%p202_p5)
}
  0x32   :  { %115 = dma.vmem_to_hbm [thread:$0]  %s110_s30, 1024, %s269_s3, [#allocation4], %s221_s15, %s221_s15, %s222_s16  }
  0x33   :  { %218 = dma.done.wait [#allocation4], 1024  }
  0x34   :  { %219 = vsyncadd [#allocation4], 4294966272 }
  0x35   :  { %119 = vsyncpa [#allocation3], 1 }
  0x36   :  { %120 = vsyncpa [#allocation6], 1 }
  0x37   :  { %121 = vsyncpa [#allocation4], 1 }

</bundles_post_ra>
